<compile_context>
chip_gen: v5e
topology: v5e:2x2
jax: 0.10.0
libtpu: 0.0.40
codegen_flags: <defaults>
</compile_context>

<pallas_src>
import functools

import jax
import jax.numpy as jnp
from jax.experimental import pallas as pl
from jax.experimental.pallas import tpu as pltpu


def _vq_argmin_kernel(z_ref, e_ref, esq_ref, idx_ref, *, tile_k, num_k_chunks):
    """Nearest-codebook-row search for one tile of N rows.

    z_ref   : (TN, H)     f32   encoder rows for this tile (streamed)
    e_ref   : (K_pad, H)  bf16  codebook (VMEM-resident across the grid)
    esq_ref : (K_pad, 1)  f32   0.5 * ||e||^2  (padded rows = 1e30)
    idx_ref : (1, 1, TN)  i32   argmin codebook index per row (lane-dense)
    """
    z = z_ref[...]                                    # (TN, H) f32
    tn, _ = z.shape
    z_bf16 = z.astype(jnp.bfloat16)                   # one cast per tile

    # Hoisted: constant across K chunks (JAX does not CSE broadcast_in_dim).
    row = jax.lax.broadcasted_iota(jnp.int32, (tile_k, tn), 0)

    def k_chunk(c, carry):
        min_d, idx = carry
        k0 = pl.multiple_of(c * tile_k, tile_k)
        e_chunk = e_ref[pl.ds(k0, tile_k), :]         # (TK, H) bf16, resident
        esq_chunk = esq_ref[pl.ds(k0, tile_k), :]     # (TK, 1) f32

        # d/2 = 0.5*||e||^2 - e . z   (||z||^2 dropped, x2 folded into esq:
        # both are argmin-invariant).  bf16 MXU inputs, f32 accumulation;
        # the argmin compares stay f32.
        ez = jax.lax.dot_general(
            e_chunk, z_bf16, (((1,), (1,)), ((), ())),
            preferred_element_type=jnp.float32)        # (TK, TN)
        d = esq_chunk - ez                             # col broadcast over lanes

        chunk_min = jnp.min(d, axis=0, keepdims=True)              # (1, TN)
        # first minimum within the chunk (torch.argmin picks the first)
        local_arg = jnp.min(jnp.where(d == chunk_min, row, tile_k),
                            axis=0, keepdims=True)                 # (1, TN) i32
        # strict '<' keeps the earliest global minimum across chunks
        improved = chunk_min < min_d
        min_d = jnp.where(improved, chunk_min, min_d)
        idx = jnp.where(improved, local_arg + k0, idx)
        return min_d, idx

    init = (jnp.full((1, tn), 3.0e38, jnp.float32),
            jnp.zeros((1, tn), jnp.int32))
    _, idx = jax.lax.fori_loop(0, num_k_chunks, k_chunk, init,
                               unroll=min(num_k_chunks, 4))
    idx_ref[...] = idx.reshape(1, 1, tn)


def vector_quantizer_forward(z, mask, embedding, beta, *, tile_n=None, tile_k=None):
    """Forward pass of VectorQuantizer.

    z: (B, S, H) float, mask: (B, S) float, embedding: (n_e, e_dim=H) float.
    Returns {'quantized_feats', 'quantized_indices', 'commit_loss'}.
    """
    B, S, H = z.shape
    n_e, e_dim = embedding.shape
    assert e_dim == H
    N = B * S

    def _round_up(x, m):
        return (x + m - 1) // m * m

    z = z.astype(jnp.float32)
    mask = mask.astype(jnp.float32)
    emb_f32 = embedding.astype(jnp.float32)

    # --- tiling --------------------------------------------------------------
    # Codebook chunk: multiple of 128 so the (TK, TN) distance block, the esq
    # slice and the argmin iota stay 128-aligned (no masked lane ops).
    if tile_k is None:
        tile_k = min(512, _round_up(n_e, 128))
    tile_k = _round_up(tile_k, 128)
    k_pad = _round_up(n_e, tile_k)
    num_k_chunks = k_pad // tile_k

    # Row tile: large (amortizes the ~0.35us/grid-step overhead), capped so the
    # streamed z tile stays <= ~8 MiB, and split so >=2 tiles exist whenever
    # possible (both v7x TensorCores get work under "parallel" semantics).
    if tile_n is None:
        tile_n = 512
    max_rows_by_vmem = max(8, ((8 << 20) // (H * 4)) // 8 * 8)
    tile_n = _round_up(min(tile_n, max_rows_by_vmem, _round_up(N, 8)), 8)
    if _round_up(N, tile_n) // tile_n < 2 and N > 8:
        tile_n = _round_up((N + 1) // 2, 8)
    n_pad = _round_up(N, tile_n)
    num_tiles = n_pad // tile_n

    # --- kernel inputs ---------------------------------------------------------
    z_flat = z.reshape(N, H)
    if n_pad != N:
        z_flat = jnp.pad(z_flat, ((0, n_pad - N), (0, 0)))

    emb_bf16 = emb_f32.astype(jnp.bfloat16)                          # cast once
    esq_half = 0.5 * jnp.sum(emb_f32 * emb_f32, axis=1, keepdims=True)  # (n_e,1)
    if k_pad != n_e:
        emb_bf16 = jnp.pad(emb_bf16, ((0, k_pad - n_e), (0, 0)))
        # Padded codebook rows get a huge half-norm so they never win argmin.
        esq_half = jnp.pad(esq_half, ((0, k_pad - n_e), (0, 0)),
                           constant_values=1e30)

    # --- VMEM budget -----------------------------------------------------------
    f32b, bf16b, i32b = 4, 2, 4
    resident = 2 * (k_pad * H * bf16b + k_pad * f32b)     # codebook + norms (2x buffered)
    streamed = 2 * (tile_n * H * f32b + tile_n * i32b)    # z in + idx out (2x buffered)
    live = 3 * tile_k * tile_n * f32b + 3 * tile_n * H * f32b
    need = resident + streamed + live + (4 << 20)
    try:
        cap = int(pltpu.get_tpu_info().vmem_capacity_bytes)
    except Exception:
        cap = 64 << 20                                    # conservative: v7x per-core
    vmem_limit = int(min(max(need, 32 << 20), (3 * cap) // 4, 100 << 20))

    kernel = functools.partial(_vq_argmin_kernel, tile_k=tile_k,
                               num_k_chunks=num_k_chunks)

    cost = pl.CostEstimate(
        flops=2 * n_pad * k_pad * H,
        transcendentals=0,
        bytes_accessed=(n_pad * H * f32b + k_pad * H * bf16b
                        + k_pad * f32b + n_pad * i32b),
    )

    idx_tiles = pl.pallas_call(
        kernel,
        grid=(num_tiles,),
        out_shape=jax.ShapeDtypeStruct((num_tiles, 1, tile_n), jnp.int32),
        in_specs=[
            pl.BlockSpec((tile_n, H), lambda i: (i, 0)),       # z rows (streamed)
            pl.BlockSpec((k_pad, H), lambda i: (0, 0)),        # bf16 codebook (resident)
            pl.BlockSpec((k_pad, 1), lambda i: (0, 0)),        # 0.5*||e||^2 (resident)
        ],
        out_specs=pl.BlockSpec((1, 1, tile_n), lambda i: (i, 0, 0)),  # lane-dense idx
        compiler_params=pltpu.CompilerParams(
            dimension_semantics=("parallel",),                 # no cross-tile accumulator
            vmem_limit_bytes=vmem_limit,
        ),
        cost_estimate=cost,
    )(z_flat, emb_bf16, esq_half)

    idx = idx_tiles.reshape(n_pad)[:N]                          # (N,) int32

    # Exact f32 gather of the selected codebook rows, and the commit loss from
    # those rows -- quantized_feats / loss carry no bf16 error.
    z_q_rows = jnp.take(emb_f32, idx, axis=0)                   # (N, H)
    z_q = z_q_rows.reshape(B, S, H)
    # Straight-through: forward value of z + (z_q - z).detach() is exactly z_q.
    diff = z_q - z
    # torch: mean over all B*S*H elements, mask applied as a weight;
    # forward value of loss = (1 + beta) * that mean.
    commit_loss = (1.0 + beta) * jnp.mean(diff * diff * mask[..., None])

    # NOTE: e_mean / perplexity are computed by the torch module but never
    # returned, so they are intentionally omitted here.
    # TODO(synk): straight-through / stop-gradient semantics only affect the
    # backward pass; this forward-only kernel matches the forward values.
    return {
        'quantized_feats': z_q,
        'quantized_indices': idx[:, None],
        'commit_loss': commit_loss,
    }


if __name__ == "__main__":
    # Module hyper-params, consistent with z.shape = (batch, seq, hidden).
    n_e, e_dim, beta = 16, 32, 0.25
    B, S, H = 2, 8, e_dim

    key = jax.random.PRNGKey(0)
    k_emb, k_z, k_m = jax.random.split(key, 3)

    # embedding.weight.data.uniform_(-1/n_e, 1/n_e)
    embedding = jax.random.uniform(
        k_emb, (n_e, e_dim), jnp.float32, minval=-1.0 / n_e, maxval=1.0 / n_e)
    z = jax.random.normal(k_z, (B, S, H), jnp.float32)
    mask = (jax.random.uniform(k_m, (B, S)) > 0.3).astype(jnp.float32)

    out = vector_quantizer_forward(z, mask, embedding, beta)
    jax.block_until_ready(out)

    # ---- sanity checks against a plain-JAX (f32) reference -------------------
    z_flat = z.reshape(-1, H)
    d_ref = (jnp.sum(z_flat ** 2, 1, keepdims=True)
             + jnp.sum(embedding ** 2, 1)
             - 2.0 * z_flat @ embedding.T)
    idx_k = out['quantized_indices'][:, 0]

    # The bf16 distance matmul can only disagree with the f32 argmin at
    # numerical near-ties; the chosen code's true distance must be within a
    # small tolerance of the true minimum.
    d_pick = jnp.take_along_axis(d_ref, idx_k[:, None], axis=1)[:, 0]
    assert jnp.all(d_pick <= jnp.min(d_ref, axis=1) + 5e-2)

    # Quantized feats are exactly the selected codebook rows (f32 gather path).
    assert jnp.allclose(out['quantized_feats'].reshape(-1, H),
                        embedding[idx_k], atol=1e-6)

    # Commit loss consistent with the kernel's own code selection.
    zq_ref = embedding[idx_k].reshape(B, S, H)
    loss_ref = (1.0 + beta) * jnp.mean((zq_ref - z) ** 2 * mask[..., None])
    assert jnp.allclose(out['commit_loss'], loss_ref, rtol=1e-5, atol=1e-7)

    assert out['quantized_feats'].shape == (B, S, H)
    assert out['quantized_indices'].shape == (B * S, 1)

    print("KERNEL_OK")
</pallas_src>

<mosaic_0001>
module attributes {stable_mosaic.version = 11 : i64} {
  func.func @_vq_argmin_kernel(%arg0: i32, %arg1: memref<8x32xf32, #tpu.memory_space<vmem>>, %arg2: memref<128x32xbf16, #tpu.memory_space<vmem>>, %arg3: memref<128x1xf32, #tpu.memory_space<vmem>>, %arg4: memref<1x1x8xi32, #tpu.memory_space<vmem>>) attributes {dimension_semantics = [#tpu.dimension_semantics<parallel>], iteration_bounds = array<i64: 2>, scalar_prefetch = 0 : i64, scratch_operands = 0 : i64, tpu.core_type = #tpu.core_type<tc>, window_params = [{transform_indices = @transform_0, window_bounds = array<i64: 8, 32>}, {pipeline_mode = #tpu.pipeline_mode<synchronous>, transform_indices = @transform_1, window_bounds = array<i64: 128, 32>}, {pipeline_mode = #tpu.pipeline_mode<synchronous>, transform_indices = @transform_2, window_bounds = array<i64: 128, 1>}, {transform_indices = @transform_3, window_bounds = array<i64: 1, 1, 8>}]} {
    %c0 = arith.constant 0 : index
    %c0_0 = arith.constant 0 : index
    %0 = vector.load %arg1[%c0, %c0_0] : memref<8x32xf32, #tpu.memory_space<vmem>>, vector<8x32xf32>
    %1 = arith.truncf %0 : vector<8x32xf32> to vector<8x32xbf16>
    %2 = tpu.iota {dimensions = array<i32: 0>} : vector<128x8xi32>
    %cst = arith.constant 3.000000e+38 : f32
    %3 = vector.broadcast %cst : f32 to vector<1x8xf32>
    %c0_i32 = arith.constant 0 : i32
    %4 = vector.broadcast %c0_i32 : i32 to vector<1x8xi32>
    %c0_i32_1 = arith.constant 0 : i32
    %c128_i32 = arith.constant 128 : i32
    %5 = arith.muli %c0_i32_1, %c128_i32 : i32
    %6 = tpu.assume_multiple %5, 128 : i32
    %7 = arith.index_cast %6 : i32 to index
    %c0_2 = arith.constant 0 : index
    %8 = vector.load %arg2[%7, %c0_2] : memref<128x32xbf16, #tpu.memory_space<vmem>>, vector<128x32xbf16>
    %9 = arith.index_cast %6 : i32 to index
    %c0_3 = arith.constant 0 : index
    %10 = vector.load %arg3[%9, %c0_3] : memref<128x1xf32, #tpu.memory_space<vmem>>, vector<128x1xf32>
    %cst_4 = arith.constant dense<0.000000e+00> : vector<128x8xf32>
    %11 = tpu.matmul %8, %1, %cst_4 {dimension_numbers = #tpu.dot_dimension_numbers<[1], [1], [0], [0], [0, 0, 1, 0], [], []>} : vector<128x32xbf16>, vector<8x32xbf16>, vector<128x8xf32> -> vector<128x8xf32>
    %12 = vector.broadcast %10 : vector<128x1xf32> to vector<128x8xf32>
    %13 = arith.subf %12, %11 : vector<128x8xf32>
    %cst_5 = arith.constant dense<0x7F800000> : vector<8xf32>
    %14 = vector.multi_reduction <minimumf>, %13, %cst_5 [0] : vector<128x8xf32> to vector<8xf32>
    %15 = vector.shape_cast %14 : vector<8xf32> to vector<1x8xf32>
    %16 = vector.broadcast %15 : vector<1x8xf32> to vector<128x8xf32>
    %17 = arith.cmpf oeq, %13, %16 : vector<128x8xf32>
    %c128_i32_6 = arith.constant 128 : i32
    %18 = vector.broadcast %c128_i32_6 : i32 to vector<128x8xi32>
    %19 = arith.select %17, %2, %18 : vector<128x8xi1>, vector<128x8xi32>
    %cst_7 = arith.constant dense<2147483647> : vector<8xi32>
    %20 = vector.multi_reduction <minsi>, %19, %cst_7 [0] : vector<128x8xi32> to vector<8xi32>
    %21 = vector.shape_cast %20 : vector<8xi32> to vector<1x8xi32>
    %22 = arith.cmpf olt, %15, %3 : vector<1x8xf32>
    %23 = arith.select %22, %15, %3 : vector<1x8xi1>, vector<1x8xf32>
    %24 = vector.broadcast %6 : i32 to vector<1x8xi32>
    %25 = arith.addi %21, %24 : vector<1x8xi32>
    %26 = arith.select %22, %25, %4 : vector<1x8xi1>, vector<1x8xi32>
    %c1_i32 = arith.constant 1 : i32
    %27 = vector.shape_cast %26 : vector<1x8xi32> to vector<1x1x8xi32>
    %c0_8 = arith.constant 0 : index
    %c0_9 = arith.constant 0 : index
    %c0_10 = arith.constant 0 : index
    %28 = vector.load %arg4[%c0_8, %c0_9, %c0_10] : memref<1x1x8xi32, #tpu.memory_space<vmem>>, vector<1x1x8xi32>
    tpu.vector_store %arg4[%c0_8, %c0_9, %c0_10], %27 {strides = array<i32>} : memref<1x1x8xi32, #tpu.memory_space<vmem>>, vector<1x1x8xi32>,
    return
  }
  func.func @transform_0(%arg0: i32) -> (i32, i32) {
    %c0_i32 = arith.constant 0 : i32
    %c0_i32_0 = arith.constant 0 : i32
    return %arg0, %c0_i32 : i32, i32
  }
  func.func @transform_1(%arg0: i32) -> (i32, i32) {
    %c0_i32 = arith.constant 0 : i32
    %c0_i32_0 = arith.constant 0 : i32
    %c0_i32_1 = arith.constant 0 : i32
    return %c0_i32, %c0_i32_0 : i32, i32
  }
  func.func @transform_2(%arg0: i32) -> (i32, i32) {
    %c0_i32 = arith.constant 0 : i32
    %c0_i32_0 = arith.constant 0 : i32
    %c0_i32_1 = arith.constant 0 : i32
    return %c0_i32, %c0_i32_0 : i32, i32
  }
  func.func @transform_3(%arg0: i32) -> (i32, i32, i32) {
    %c0_i32 = arith.constant 0 : i32
    %c0_i32_0 = arith.constant 0 : i32
    %c0_i32_1 = arith.constant 0 : i32
    return %arg0, %c0_i32, %c0_i32_0 : i32, i32, i32
  }
}

</mosaic_0001>

<bundles_post_ra>
// kernel: tpu_custom_call.1
= control target key start
LH: loop header
LB: loop body
LE: loop exit
PB: predicated region body
PF: predicated region fallthrough
CT: control target
= control target key end

     0   :  { %8 = vsyncpa [#allocation3], 0  ;;  %s1144_s0 = inlined_call_operand.vmem [shape: f32[16,32], index: 0, kind: input, shape index: {}]   ;;  %s1145_s1 = inlined_call_operand.vmem [shape: bf16[128,32], index: 1, kind: input, shape index: {}]   ;;  %s1146_s2 = inlined_call_operand.vmem [shape: f32[128,1], index: 2, kind: input, shape index: {}]   ;;  %s1147_s3 = inlined_call_operand.hbm [shape: s32[2,1,8], index: 3, kind: output, shape index: {}]  }
   0x1   :  { %10 = vsyncpa [#allocation3 + $0x1], 0  ;;  %s815_s12 = smov 0   ;;  %s817_s13 = smov 0  }
   0x2   :  { %s819_s14 = smov 0   ;;  %s821_s15 = smov 0  }
   0x3 LB: > { %s836_s16 = sadd.s32 4294967295, %s792_s15   ;;  %s629_s17 = sadd.s32 4294967294, %s792_s15   ;;  %s792_s15 = sphi %s821_s15, %s1169_s15   ;;  %s788_s14 = sphi %s819_s14, %s1168_s14   ;;  %s784_s13 = sphi %s817_s13, %s1167_s13   ;;  %s780_s12 = sphi %s815_s12, %s1166_s12  }
   0x4   : > { %s840_s18 = sadd.s32 1, %s792_s15   ;;  %s91_s19 = sadd.s32 1, %s788_s14 }
   0x5   : > { %s88_s20 = ssub.s32 %s792_s15, %s840_s18  ;;  %p101_p0 = scmp.ne.s32.totalorder %s788_s14, %s784_s13 }
   0x6   : > { %p89_p1 = scmp.eq.s32.totalorder %s88_s20, 0  ;;  %p102_p2 = scmp.eq.s32.totalorder %s836_s16, 1 }
   0x7   : > { %p107_p3 = scmp.ne.s32.totalorder %s784_s13, %s780_s12  ;;  %p108_p4 = scmp.eq.s32.totalorder %s629_s17, 1 }
   0x8   : > { %s851_s21 = scalar_select %p89_p1, %s788_s14, %s91_s19  }
   0x9   : > { %p853_p5 = por %p102_p2, %p101_p0  ;;  %p857_p6 = por %p108_p4, %p107_p3 }
   0xa   : > { %p632_p7 = scmp.ge.s32.totalorder %s792_s15, 1  ;;  %p139_p8 = scmp.lt.s32.totalorder %s792_s15, 3 }
   0xc   : > { %p140_p9 = pnand %p632_p7, %p139_p8 }
   0xd   : > { %p161_p10 = scmp.lt.s32.totalorder (!%p140_p9), %s836_s16, 1  ;;  %s159_s20 = sand.u32 (!%p140_p9), 1, %s784_s13  }
   0xe   : > { %143 = sbr.rel (%p140_p9) target bundleno = 260 (0x104), region = 32  ;;  %s570_s26 = scalar_lea.hbm (!%p140_p9), %s1147_s3, %s836_s16 }
   0xf   : > { %s160_s27 = scalar_lea.vmem (!%p140_p9), [#allocation2], %s159_s20  ;;  %s574_s29 = sshll.u32 (!%p140_p9), %s570_s26, 4  ;;  %s575_s29 = int_to_ptr.hbm [resolvable:$true] %s574_s29 }
  0x10   : > { %s562_s30 = scalar_lea.sflag (!%p140_p9), [#allocation3], %s159_s20 }
  0x13   : > { %v203_v0 = vld [vmem:[%s1146_s2 + $0x10] sm:$0xff]  ;;  %v201_v1 = vld [vmem:[%s1146_s2] sm:$0xff]  ;;  %v794_v2 = vmov 0   ;;  %s162_s28 = scalar_select %p161_p10, %s836_s16, 1  ;;  %vm257_vm0 = vcmask 261120   ;;  %v204_v5 = vld [vmem:[%s1146_s2 + $0x18] sm:$0xff] }
  0x14   : > { %728 = vset.pattern.permute.xlu1 %v794_v2  ;;  %727 = vset.pattern.permute.xlu0 %v794_v2  ;;  %v205_v3 = vld [vmem:[%s1146_s2 + $0x20] sm:$0xff]  ;;  %v202_v6 = vld [vmem:[%s1146_s2 + $0x8] sm:$0xff]  ;;  %v678_v11 = vld [vmem:[%s1145_s1 + $0x10] sm:$0xff]  ;;  %vm1148_vm1 = vcmask 64512  }
  0x15   : > { %346 = vperm.xlu1 %728, %v203_v0   ;;  %336 = vperm.xlu0 %727, %v201_v1   ;;  %s633_s4 = sshll.u32 %s162_s28, 3  ;;  %v206_v9 = vld [vmem:[%s1146_s2 + $0x28] sm:$0xff]  ;;  %v676_v10 = vld [vmem:[%s1145_s1] sm:$0xff]  ;;  %v682_v13 = vld [vmem:[%s1145_s1 + $0x30] sm:$0xff]  ;;  %s572_s28 = sshll.u32 %s160_s27, 4  ;;  %s573_s28 = int_to_ptr.vmem [resolvable:$true] %s572_s28 }
  0x16   : > { %729 = vset.pattern.permute.xlu2 %v794_v2  ;;  %s164_s7 = scalar_lea.vmem %s1144_s0, %s633_s4  ;;  %v680_v12 = vld [vmem:[%s1145_s1 + $0x20] sm:$0xff]  ;;  %v208_v14 = vld [vmem:[%s1146_s2 + $0x38] sm:$0xff]  ;;  %v207_v15 = vld [vmem:[%s1146_s2 + $0x30] sm:$0xff]  ;;  %s744_s4 = sshra.s32 %s575_s29, 4  ;;  %s745_s4 = int_to_ptr.hbm [resolvable:$true] %s744_s4 }
  0x17   : > { %356 = vperm.xlu2 %729, %v205_v3   ;;  %v166_v4 = vld [vmem:[%s164_s7] sm:$0xff]  ;;  %v211_v17 = vld [vmem:[%s1146_s2 + $0x50] sm:$0xff]  ;;  %v210_v18 = vld [vmem:[%s1146_s2 + $0x48] sm:$0xff]  ;;  %s746_s16 = scalar_lea.hbm %s745_s4, 1  ;;  %s750_s7 = scalar_lea.hbm %s1147_s3, 2 }
  0x18   : > { %v167_v7 = vpack.c.bf16 %v166_v4, %v166_v4  ;;  %v209_v16 = vld [vmem:[%s1146_s2 + $0x40] sm:$0xff]  ;;  %v212_v19 = vld [vmem:[%s1146_s2 + $0x58] sm:$0xff]  ;;  %v677_v20 = vld [vmem:[%s1145_s1 + $0x8] sm:$0xff]  ;;  %p747_p11 = scmp.ne.s32.totalorder %s745_s4, %s746_s16  ;;  %p751_p0 = scmp.lt.s32.totalorder %s745_s4, %s1147_s3 }
  0x19   : > { %v679_v21 = vld [vmem:[%s1145_s1 + $0x18] sm:$0xff]  ;;  %v681_v22 = vld [vmem:[%s1145_s1 + $0x28] sm:$0xff]  ;;  %v213_v25 = vld [vmem:[%s1146_s2 + $0x60] sm:$0xff]  ;;  %p752_p1 = scmp.lt.s32.totalorder %s750_s7, %s746_s16 }
  0x1a   : > { %v283_v8 = vsel %vm257_vm0, %v167_v7, 0  ;;  %v683_v23 = vld [vmem:[%s1145_s1 + $0x38] sm:$0xff]  ;;  %v214_v24 = vld [vmem:[%s1146_s2 + $0x68] sm:$0xff]  ;;  %v215_v26 = vld [vmem:[%s1146_s2 + $0x70] sm:$0xff]  ;;  %p748_p12 = pnand %p747_p11, %p853_p5 }
  0x1b   : > { %292 = vmatpush.bf16.xpose.msra.mxu0 %v283_v8  ;;  %684 = vmatpush.bf16.xpose.msra.mxu1 %v283_v8  ;;  %v216_v27 = vld [vmem:[%s1146_s2 + $0x78] sm:$0xff]  ;;  %p753_p2 = por %p752_p1, %p751_p0 }
  0x1c   : > { %685 = vmatpush.bf16.xpose.msra.mxu2 %v283_v8  ;;  %686 = vmatpush.bf16.xpose.msra.mxu3 %v283_v8  ;;  %p749_p13 = pneg %p748_p12 }
  0x1d   : > { %351 = vperm.xlu1 %728, %v204_v5   ;;  %341 = vperm.xlu0 %727, %v202_v6  }
  0x1e   : > { %p754_p3 = pnand %p753_p2, %p749_p13 }
  0x1f   : > { %361 = vperm.xlu2 %729, %v206_v9  }
  0x22   : > { %666 = vmatmul.msk.bf16.vlgmr.msra.gmra.mxu0 %vm257_vm0, %v676_v10  ;;  %668 = vmatmul.msk.bf16.vlgmr.msra.gmra.mxu1 %vm257_vm0, %v678_v11 }
  0x23   : > { %670 = vmatmul.msk.bf16.vlgmr.msra.gmra.mxu2 %vm257_vm0, %v680_v12  ;;  %672 = vmatmul.msk.bf16.vlgmr.msra.gmra.mxu3 %vm257_vm0, %v682_v13 }
  0x25   : > { %371 = vperm.xlu1 %728, %v208_v14   ;;  %366 = vperm.xlu0 %727, %v207_v15  }
  0x27   : > { %376 = vperm.xlu2 %729, %v209_v16  }
  0x2d   : > { %386 = vperm.xlu1 %728, %v211_v17   ;;  %381 = vperm.xlu0 %727, %v210_v18  }
  0x2f   : > { %391 = vperm.xlu2 %729, %v212_v19  }
  0x32   : > { %667 = vmatmul.msk.bf16.gmra.mxu0 %vm257_vm0, %v677_v20  ;;  %669 = vmatmul.msk.bf16.gmra.mxu1 %vm257_vm0, %v679_v21 }
  0x33   : > { %671 = vmatmul.msk.bf16.gmra.mxu2 %vm257_vm0, %v681_v22  ;;  %673 = vmatmul.msk.bf16.gmra.mxu3 %vm257_vm0, %v683_v23 }
  0x35   : > { %401 = vperm.xlu1 %728, %v214_v24   ;;  %396 = vperm.xlu0 %727, %v213_v25  }
  0x37   : > { %406 = vperm.xlu2 %729, %v215_v26  }
  0x3d   : > { %411 = vperm.xlu0 %727, %v216_v27  }
  0x71   : > { %v357_v30 = vpop.permute.xlu2 %356 }
  0x79   : > { %v362_v35 = vpop.permute.xlu2 %361 }
  0x81   : > { %v377_v42 = vpop.permute.xlu2 %376 }
  0x87   : > { %v337_v28 = vpop.permute.xlu0 %336  ;;  %v347_v29 = vpop.permute.xlu1 %346 }
  0x89   : > { %v392_v49 = vpop.permute.xlu2 %391 }
  0x8f   : > { %v342_v31 = vpop.permute.xlu0 %341  ;;  %v352_v32 = vpop.permute.xlu1 %351 }
  0x91   : > { %v407_v12 = vpop.permute.xlu2 %406 }
  0x97   : > { %v367_v36 = vpop.permute.xlu0 %366  ;;  %v372_v41 = vpop.permute.xlu1 %371 }
  0x9f   : > { %v294_v33 = vpop.f32.mrf.mxu0  ;;  %v304_v34 = vpop.f32.mrf.mxu1 }
  0xa0   : > { %v382_v43 = vpop.permute.xlu0 %381  ;;  %v387_v48 = vpop.permute.xlu1 %386  ;;  %v953_v53 = vsub.f32 %v337_v28, %v294_v33  ;;  %v955_v56 = vsub.f32 %v357_v30, %v304_v34 }
  0xa2   : > { %v431_v4 = vsel %vm1148_vm1, %v953_v53, inf  ;;  %v435_v5 = vsel %vm1148_vm1, %v955_v56, inf }
  0xa3   : > { %v436_v18 = vmin.f32 %v431_v4, %v435_v5 }
  0xa6   : > { %v314_v37 = vpop.f32.mrf.mxu2  ;;  %v324_v38 = vpop.f32.mrf.mxu3 }
  0xa7   : > { %v296_v39 = vpop.f32.mrf.mxu0  ;;  %v306_v40 = vpop.f32.mrf.mxu1  ;;  %v963_v62 = vsub.f32 %v377_v42, %v314_v37 }
  0xa8   : > { %v397_v50 = vpop.permute.xlu0 %396  ;;  %v949_v51 = vsub.f32 %v342_v31, %v296_v39  ;;  %v951_v52 = vsub.f32 %v362_v35, %v306_v40  ;;  %v402_v9 = vpop.permute.xlu1 %401 }
  0xa9   : > { %v443_v10 = vsel %vm1148_vm1, %v963_v62, inf  ;;  %v995_v23 = vsub.f32 %v397_v50, %v324_v38 }
  0xaa   : > { %v432_v63 = vsel %vm1148_vm1, %v949_v51, inf  ;;  %v437_v0 = vsel %vm1148_vm1, %v951_v52, inf  ;;  %v444_v27 = vmin.f32 %v436_v18, %v443_v10 }
  0xab   : > { %v438_v11 = vmin.f32 %v432_v63, %v437_v0  ;;  %v451_v34 = vsel %vm1148_vm1, %v995_v23, inf }
  0xac   : > { %v452_v37 = vmin.f32 %v444_v27, %v451_v34 }
  0xae   : > { %v316_v44 = vpop.f32.mrf.mxu2  ;;  %v326_v45 = vpop.f32.mrf.mxu3 }
  0xaf   : > { %v299_v46 = vpop.f32.mrf.mxu0  ;;  %v309_v47 = vpop.f32.mrf.mxu1  ;;  %v957_v57 = vsub.f32 %v382_v43, %v316_v44  ;;  %v987_v14 = vsub.f32 %v402_v9, %v326_v45  ;;  %v168_v43 = vlaneseq }
  0xb0   : > { %v959_v58 = vsub.f32 %v347_v29, %v299_v46  ;;  %v961_v59 = vsub.f32 %v367_v36, %v309_v47  ;;  %v412_v13 = vpop.permute.xlu0 %411 }
  0xb1   : > { %v445_v6 = vsel %vm1148_vm1, %v957_v57, inf  ;;  %v453_v30 = vsel %vm1148_vm1, %v987_v14, inf  ;;  %v169_v46 = vshrl.u32 %v168_v43, 7 }
  0xb2   : > { %v433_v7 = vsel %vm1148_vm1, %v959_v58, inf  ;;  %v439_v8 = vsel %vm1148_vm1, %v961_v59, inf  ;;  %v446_v19 = vmin.f32 %v438_v11, %v445_v6 }
  0xb3   : > { %v440_v20 = vmin.f32 %v433_v7, %v439_v8  ;;  %v171_v50 = vadd.s32 16, %v169_v46  ;;  %v175_v63 = vadd.s32 48, %v169_v46  ;;  %v176_v0 = vadd.s32 56, %v169_v46 }
  0xb4   : > { %v177_v4 = vadd.s32 64, %v169_v46  ;;  %v178_v5 = vadd.s32 72, %v169_v46  ;;  %v179_v6 = vadd.s32 80, %v169_v46  ;;  %v180_v7 = vadd.s32 88, %v169_v46 }
  0xb5   : > { %v181_v9 = vadd.s32 96, %v169_v46  ;;  %v182_v10 = vadd.s32 104, %v169_v46  ;;  %v183_v11 = vadd.s32 112, %v169_v46 }
  0xb6   : > { %v319_v54 = vpop.f32.mrf.mxu2  ;;  %v329_v55 = vpop.f32.mrf.mxu3 }
  0xb7   : > { %v301_v60 = vpop.f32.mrf.mxu0  ;;  %v311_v61 = vpop.f32.mrf.mxu1  ;;  %v969_v1 = vsub.f32 %v387_v48, %v319_v54  ;;  %v997_v24 = vsub.f32 %v407_v12, %v329_v55  ;;  %v172_v54 = vadd.s32 24, %v169_v46  ;;  %v173_v55 = vadd.s32 32, %v169_v46 }
  0xb8   : > { %v971_v2 = vsub.f32 %v352_v32, %v301_v60  ;;  %v973_v3 = vsub.f32 %v372_v41, %v311_v61  ;;  %v454_v32 = vmin.f32 %v446_v19, %v453_v30  ;;  %v174_v61 = vadd.s32 40, %v169_v46 }
  0xb9   : > { %v447_v15 = vsel %vm1148_vm1, %v969_v1, inf  ;;  %v455_v35 = vsel %vm1148_vm1, %v997_v24, inf  ;;  %v184_v12 = vadd.s32 120, %v169_v46 }
  0xba   : > { %v434_v16 = vsel %vm1148_vm1, %v971_v2, inf  ;;  %v441_v17 = vsel %vm1148_vm1, %v973_v3, inf  ;;  %v448_v28 = vmin.f32 %v440_v20, %v447_v15  ;;  %v459_v40 = vmin.f32 %v452_v37, %v454_v32 }
  0xbb   : > { %v442_v29 = vmin.f32 %v434_v16, %v441_v17 }
  0xbc   : > { %v456_v38 = vmin.f32 %v448_v28, %v455_v35 }
  0xbe   : > { %v321_v21 = vpop.f32.mrf.mxu2  ;;  %v331_v22 = vpop.f32.mrf.mxu3 }
  0xbf   : > { %v999_v25 = vsub.f32 %v392_v49, %v321_v21  ;;  %v1001_v26 = vsub.f32 %v412_v13, %v331_v22  ;;  %v170_v49 = vadd.s32 8, %v169_v46 }
  0xc1   : > { %v449_v31 = vsel %vm1148_vm1, %v999_v25, inf  ;;  %v457_v36 = vsel %vm1148_vm1, %v1001_v26, inf }
  0xc2   : > { %v450_v33 = vmin.f32 %v442_v29, %v449_v31 }
  0xc4   : > { %v458_v39 = vmin.f32 %v450_v33, %v457_v36 }
  0xc6   : > { %v460_v41 = vmin.f32 %v456_v38, %v458_v39 }
  0xc8   : > { %v461_v42 = vmin.f32 %v459_v40, %v460_v41 }
  0xca   : > { %v462_v44 = vrot.slane %v461_v42, 4 }
  0xcc   : > { %v463_v45 = vmin.f32 %v461_v42, %v462_v44 }
  0xce   : > { %v464_v47 = vrot.slane %v463_v45, 2 }
  0xd0   : > { %v465_v48 = vmin.f32 %v463_v45, %v464_v47 }
  0xd2   : > { %v466_v60 = vrot.slane %v465_v48, 1 }
  0xd4   : > { %v1013_v8 = vmin.f32 %v465_v48, %v466_v60 }
  0xd6   : > { %vm468_vm2 = vcmp.eq.f32.partialorder %v953_v53, %v1013_v8  ;;  %vm469_vm3 = vcmp.eq.f32.partialorder %v949_v51, %v1013_v8  ;;  %vm470_vm4 = vcmp.eq.f32.partialorder %v959_v58, %v1013_v8  ;;  %vm471_vm5 = vcmp.eq.f32.partialorder %v971_v2, %v1013_v8 }
  0xd7   : > { %vm472_vm6 = vcmp.eq.f32.partialorder %v955_v56, %v1013_v8  ;;  %vm473_vm7 = vcmp.eq.f32.partialorder %v951_v52, %v1013_v8  ;;  %vm474_vm8 = vcmp.eq.f32.partialorder %v961_v59, %v1013_v8  ;;  %vm475_vm9 = vcmp.eq.f32.partialorder %v973_v3, %v1013_v8 }
  0xd8   : > { %vm476_vm10 = vcmp.eq.f32.partialorder %v963_v62, %v1013_v8  ;;  %vm477_vm11 = vcmp.eq.f32.partialorder %v957_v57, %v1013_v8  ;;  %vm478_vm12 = vcmp.eq.f32.partialorder %v969_v1, %v1013_v8  ;;  %vm479_vm13 = vcmp.eq.f32.partialorder %v999_v25, %v1013_v8 }
  0xd9   : > { %vm480_vm14 = vcmp.eq.f32.partialorder %v995_v23, %v1013_v8  ;;  %vm481_vm15 = vcmp.eq.f32.partialorder %v987_v14, %v1013_v8  ;;  %vm482_vm0 = vcmp.eq.f32.partialorder %v997_v24, %v1013_v8  ;;  %vm483_vm1 = vcmp.eq.f32.partialorder %v1001_v26, %v1013_v8 }
  0xda   : > { %v484_v13 = vsel %vm468_vm2, %v169_v46, 128  ;;  %v485_v15 = vsel %vm469_vm3, %v170_v49, 128  ;;  %v486_v16 = vsel %vm470_vm4, %v171_v50, 128  ;;  %v487_v17 = vsel %vm471_vm5, %v172_v54, 128 }
  0xdb   : > { %v488_v18 = vsel %vm472_vm6, %v173_v55, 128  ;;  %v489_v53 = vsel %vm473_vm7, %v174_v61, 128  ;;  %v490_v51 = vsel %vm474_vm8, %v175_v63, 128  ;;  %v491_v58 = vsel %vm475_vm9, %v176_v0, 128 }
  0xdc   : > { %v492_v2 = vsel %vm476_vm10, %v177_v4, 128  ;;  %v493_v56 = vsel %vm477_vm11, %v178_v5, 128  ;;  %v494_v52 = vsel %vm478_vm12, %v179_v6, 128  ;;  %v495_v59 = vsel %vm479_vm13, %v180_v7, 128 }
  0xdd   : > { %v496_v3 = vsel %vm480_vm14, %v181_v9, 128  ;;  %v497_v62 = vsel %vm481_vm15, %v182_v10, 128  ;;  %v498_v57 = vsel %vm482_vm0, %v183_v11, 128  ;;  %v499_v1 = vsel %vm483_vm1, %v184_v12, 128 }
  0xde   : > { %vm1151_vm2 = vcmask 64512  }
  0xdf   : > { %v500_v19 = vsel %vm1151_vm2, %v484_v13, 2147483647  ;;  %vm1152_vm3 = vmmov %vm1151_vm2  ;;  %v522_v32 = vsel %vm1151_vm2, %v494_v52, 2147483647 }
  0xe0   : > { %v501_v20 = vsel %vm1152_vm3, %v485_v15, 2147483647  ;;  %vm1153_vm4 = vmmov %vm1151_vm2 }
  0xe1   : > { %v502_v21 = vsel %vm1153_vm4, %v486_v16, 2147483647  ;;  %vm1154_vm5 = vmmov %vm1151_vm2 }
  0xe2   : > { %v503_v22 = vsel %vm1154_vm5, %v487_v17, 2147483647  ;;  %vm1155_vm6 = vmmov %vm1151_vm2 }
  0xe3   : > { %v504_v23 = vsel %vm1155_vm6, %v488_v18, 2147483647  ;;  %vm1156_vm7 = vmmov %vm1151_vm2 }
  0xe4   : > { %v507_v14 = vsel %vm1156_vm7, %v489_v53, 2147483647  ;;  %vm505_vm8 = vcmp.lt.s32.totalorder %v500_v19, %v504_v23  ;;  %vm1157_vm10 = vmmov %vm1151_vm2 }
  0xe5   : > { %vm508_vm9 = vcmp.lt.s32.totalorder %v501_v20, %v507_v14  ;;  %v510_v24 = vsel %vm1157_vm10, %v490_v51, 2147483647  ;;  %vm1158_vm11 = vmmov %vm1151_vm2  ;;  %v506_v26 = vsel %vm505_vm8, %v500_v19, %v504_v23 }
  0xe6   : > { %v513_v25 = vsel %vm1158_vm11, %v491_v58, 2147483647  ;;  %v509_v27 = vsel %vm508_vm9, %v501_v20, %v507_v14  ;;  %vm511_vm1 = vcmp.lt.s32.totalorder %v502_v21, %v510_v24  ;;  %vm1159_vm13 = vmmov %vm1151_vm2 }
  0xe7   : > { %vm514_vm12 = vcmp.lt.s32.totalorder %v503_v22, %v513_v25  ;;  %v512_v28 = vsel %vm511_vm1, %v502_v21, %v510_v24  ;;  %v516_v30 = vsel %vm1159_vm13, %v492_v2, 2147483647  ;;  %vm1160_vm14 = vmmov %vm1151_vm2 }
  0xe8   : > { %v515_v29 = vsel %vm514_vm12, %v503_v22, %v513_v25  ;;  %v519_v31 = vsel %vm1160_vm14, %v493_v56, 2147483647  ;;  %vm517_vm15 = vcmp.lt.s32.totalorder %v506_v26, %v516_v30  ;;  %vm1161_vm3 = vmmov %vm1151_vm2  ;;  %vm523_vm4 = vcmp.lt.s32.totalorder %v512_v28, %v522_v32 }
  0xe9   : > { %vm520_vm0 = vcmp.lt.s32.totalorder %v509_v27, %v519_v31  ;;  %v525_v33 = vsel %vm1161_vm3, %v495_v59, 2147483647  ;;  %v518_v34 = vsel %vm517_vm15, %v506_v26, %v516_v30  ;;  %v524_v36 = vsel %vm523_vm4, %v512_v28, %v522_v32  ;;  %vm1162_vm6 = vmmov %vm1151_vm2 }
  0xea   : > { %v521_v35 = vsel %vm520_vm0, %v509_v27, %v519_v31  ;;  %vm526_vm5 = vcmp.lt.s32.totalorder %v515_v29, %v525_v33  ;;  %v528_v38 = vsel %vm1162_vm6, %v496_v3, 2147483647  ;;  %vm1163_vm7 = vmmov %vm1151_vm2  ;;  %vm559_vm4 = vcmask 57344  }
  0xeb   : > { %v527_v37 = vsel %vm526_vm5, %v515_v29, %v525_v33  ;;  %v531_v39 = vsel %vm1163_vm7, %v497_v62, 2147483647  ;;  %vm529_vm8 = vcmp.lt.s32.totalorder %v518_v34, %v528_v38  ;;  %vm1164_vm10 = vmmov %vm1151_vm2  ;;  %vm555_vm5 = vcmp.lt.f32.partialorder %v1013_v8, 3e+38 }
  0xec   : > { %vm532_vm9 = vcmp.lt.s32.totalorder %v521_v35, %v531_v39  ;;  %v534_v40 = vsel %vm1164_vm10, %v498_v57, 2147483647  ;;  %vm1165_vm11 = vmmov %vm1151_vm2  ;;  %v530_v42 = vsel %vm529_vm8, %v518_v34, %v528_v38 }
  0xed   : > { %v537_v41 = vsel %vm1165_vm11, %v499_v1, 2147483647  ;;  %v533_v43 = vsel %vm532_vm9, %v521_v35, %v531_v39  ;;  %vm535_vm1 = vcmp.lt.s32.totalorder %v524_v36, %v534_v40 }
  0xee   : > { %vm538_vm12 = vcmp.lt.s32.totalorder %v527_v37, %v537_v41  ;;  %v536_v44 = vsel %vm535_vm1, %v524_v36, %v534_v40  ;;  %vm540_vm13 = vcmp.lt.s32.totalorder %v530_v42, %v533_v43 }
  0xef   : > { %v539_v45 = vsel %vm538_vm12, %v527_v37, %v537_v41  ;;  %v541_v46 = vsel %vm540_vm13, %v530_v42, %v533_v43 }
  0xf0   : > { %vm542_vm14 = vcmp.lt.s32.totalorder %v536_v44, %v539_v45 }
  0xf1   : > { %v543_v47 = vsel %vm542_vm14, %v536_v44, %v539_v45 }
  0xf2   : > { %vm544_vm15 = vcmp.lt.s32.totalorder %v541_v46, %v543_v47 }
  0xf3   : > { %v545_v48 = vsel %vm544_vm15, %v541_v46, %v543_v47 }
  0xf4   : > { %v546_v49 = vrot.slane %v545_v48, 4 }
  0xf6   : > { %vm547_vm0 = vcmp.lt.s32.totalorder %v545_v48, %v546_v49 }
  0xf7   : > { %v548_v50 = vsel %vm547_vm0, %v545_v48, %v546_v49 }
  0xf8   : > { %v549_v54 = vrot.slane %v548_v50, 2 }
  0xfa   : > { %vm550_vm2 = vcmp.lt.s32.totalorder %v548_v50, %v549_v54 }
  0xfb   : > { %v551_v55 = vsel %vm550_vm2, %v548_v50, %v549_v54 }
  0xfc   : > { %v552_v60 = vrot.slane %v551_v55, 1 }
  0xfe   : > { %vm553_vm3 = vcmp.lt.s32.totalorder %v551_v55, %v552_v60 }
  0xff   : > { %v554_v61 = vsel %vm553_vm3, %v551_v55, %v552_v60 }
 0x100   : > { %v558_v63 = vsel %vm555_vm5, %v554_v61, 0 }
 0x101   : > { %560 = vst.msk [vmem:[%s160_s27] sm:$0x1] %vm559_vm4, %v558_v63 }
 0x102   : > { %757 = shalt.err (!%p754_p3)
}
 0x103   : > { %687 = dma.vmem_to_hbm [thread:$0]  (%p853_p5), %s573_s28, 16, %s575_s29, %s562_s30  }
 0x104 PF: > { %p693_p4 = scmp.ge.s32.totalorder %s792_s15, 2  ;;  %s586_s10 = sand.u32 1, %s780_s12  }
 0x105   : > { %s587_s11 = scalar_lea.sflag [#allocation3], %s586_s10 }
 0x106   : > { %p690_p7 = pnand %p693_p4, %p857_p6 }
 0x108   : > { %p691_p8 = pneg %p690_p7 }
 0x10a   : > { %775 = dma.done.wait (%p691_p8), %s587_s11, 16  }
 0x10b   : > { %777 = vsyncadd (%p691_p8), %s587_s11, 4294967280  ;;  %p13_p9 = scmp.ge.s32.totalorder %s840_s18, 4   ;;  %s1166_s12 = smov %s784_s13 }
 0x10c   : > { %s1167_s13 = smov %s788_s14  ;;  %s1168_s14 = smov %s851_s21 }
 0x10d   : > { %s1169_s15 = smov %s840_s18  ;;  %15 = sbr.rel (!%p13_p9) target bundleno = 3 (0x3), region = 67 }
 0x112   :  { %592 = vsyncpa [#allocation3], 1 }
 0x113   :  { %594 = vsyncpa [#allocation3 + $0x1], 1 }

</bundles_post_ra>
